<compile_context>
chip_gen: v7x
topology: tpu7x:2x2x1
jax: 0.10.0
libtpu: 0.0.40
codegen_flags: <defaults>
</compile_context>

<pallas_src>
from functools import partial

import jax
import jax.numpy as jnp
from jax.experimental import pallas as pl
from jax.experimental.pallas import tpu as pltpu


# --------------------------------------------------------------------------- #
# Kernel
# --------------------------------------------------------------------------- #
def _classifier_kernel(reps_ref, mask_ref, w1_ref, b1_ref, w2_ref, b2_ref, out_ref):
    # reps_ref: [TB, T, H]  full token axis (excluded tokens zeroed via mask)
    # mask_ref: [TB, T]     f32 effective mask (0 at tokens 0 and T-1,
    #                       attention_mask[:, 2:] shifted onto tokens 1..T-2)
    reps = reps_ref[...]                       # input dtype (f32 or bf16)
    mask_f32 = mask_ref[...]                   # [TB, T] f32
    m = mask_f32.astype(reps.dtype)            # tiny cast; 0/1 values exact in bf16

    # Masked mean pooling over the token axis.
    # Multiply in the input dtype (no whole-tile f32 materialization),
    # accumulate the reduction in f32.
    summed = jnp.sum(reps * m[:, :, None], axis=1, dtype=jnp.float32)   # [TB, H]
    lens = jnp.sum(mask_f32, axis=1, keepdims=True)                     # [TB, 1]
    lens = jnp.maximum(lens, 1.0)      # guard zero-valid-token rows and pad rows

    # EUP approximate reciprocal + one Newton step (~f32 accurate for int counts).
    inv = pl.reciprocal(lens, approx=True)
    inv = inv * (2.0 - lens * inv)
    pooled = summed * inv                                               # [TB, H] f32

    # classifier head: Linear(H, 2H) -> ReLU -> Linear(2H, L_pad)
    h = jnp.dot(pooled.astype(w1_ref.dtype), w1_ref[...],
                preferred_element_type=jnp.float32) + b1_ref[...]
    h = jnp.maximum(h, 0.0)
    out = jnp.dot(h.astype(w2_ref.dtype), w2_ref[...],
                  preferred_element_type=jnp.float32) + b2_ref[...]
    out_ref[...] = out.astype(out_ref.dtype)


# --------------------------------------------------------------------------- #
# Tiling / VMEM planning (generation-aware)
# --------------------------------------------------------------------------- #
def _vmem_capacity_bytes():
    try:
        info = pltpu.get_tpu_info()
        cap = getattr(info, "vmem_capacity_bytes", None)
        if cap:
            return int(cap)
    except Exception:
        pass
    return 128 << 20  # v5e/v6e default


def _plan_tiles(B, T, H, reps_itemsize, batch_tile):
    """Pick the batch tile TB and padded batch B_pad."""
    vmem_cap = _vmem_capacity_bytes()
    small_vmem = vmem_cap <= (64 << 20)                 # v7x-class TensorCore
    # Budget for the 2x double-buffered streamed [TB, T, H] tiles.
    reps_budget = (14 << 20) if small_vmem else (48 << 20)

    if batch_tile is not None:
        tb = int(batch_tile)
        if tb < B and tb % 8 != 0:                      # (8,128) second-minor rule
            tb = ((tb + 7) // 8) * 8
    else:
        per_row = 2 * T * H * reps_itemsize             # double-buffered bytes / row
        max_tb = max(1, reps_budget // per_row)
        if B <= max_tb:
            tb = B
        else:
            tb = max(8, (max_tb // 8) * 8)
            if small_vmem:
                # Keep >= ~8 grid steps so v7x's two TensorCores each pipeline
                # >= 4 tiles (first/last DMA not fully exposed).
                while tb > 8 and pl.cdiv(B, tb) < 8:
                    tb = max(8, ((tb // 2) // 8) * 8)

    if tb >= B:
        tb = B
    tb = max(tb, 1)
    b_pad = pl.cdiv(B, tb) * tb
    return tb, b_pad, vmem_cap, small_vmem


def _vmem_limit(tb, T, H, H2, Lp, reps_itemsize, w_itemsize, vmem_cap, small_vmem):
    reps_blk = tb * T * H * reps_itemsize
    mask_blk = tb * T * 4
    out_blk = tb * Lp * 4
    # Single-buffered weights (pl.Buffered(1)) + f32 biases.
    w_bytes = H * H2 * w_itemsize + H2 * 4 + H2 * Lp * w_itemsize + Lp * 4
    needed = 2 * (reps_blk + mask_blk + out_blk) + w_bytes + (4 << 20)  # headroom
    if small_vmem:
        cap = 48 << 20                                  # leave headroom on 64 MiB parts
    else:
        cap = min(100 << 20, vmem_cap - (16 << 20))     # 128 MiB parts: go big
    return int(min(max(needed, 32 << 20), cap))


# --------------------------------------------------------------------------- #
# Wrapper
# --------------------------------------------------------------------------- #
def prepare_classifier_params(raw_params, *, weight_dtype=jnp.bfloat16):
    """One-time prep (call at module init): cast weights, pad labels to 128 lanes.

    raw_params: {'w1': [H, 2H], 'b1': [2H], 'w2': [2H, L], 'b2': [L]}  ([in, out])
    """
    w1 = jnp.asarray(raw_params["w1"]).astype(weight_dtype)
    b1 = jnp.asarray(raw_params["b1"], jnp.float32).reshape(1, -1)
    w2 = jnp.asarray(raw_params["w2"])
    b2 = jnp.asarray(raw_params["b2"], jnp.float32).reshape(1, -1)
    H2, L = w2.shape
    Lp = ((L + 127) // 128) * 128          # lane-dense output (no masked partial stores)
    w2p = jnp.zeros((H2, Lp), weight_dtype).at[:, :L].set(w2.astype(weight_dtype))
    b2p = jnp.zeros((1, Lp), jnp.float32).at[:, :L].set(b2)
    return {"w1": w1, "b1": b1, "w2p": w2p, "b2p": b2p, "label_size": int(L)}


@partial(jax.jit, static_argnames=("label_size", "batch_tile"))
def _forward_impl(last_hidden_state, attention_mask, w1, b1, w2p, b2p,
                  *, label_size, batch_tile):
    B, T, H = last_hidden_state.shape
    H2 = w1.shape[1]
    Lp = w2p.shape[1]
    reps_itemsize = last_hidden_state.dtype.itemsize
    w_itemsize = w1.dtype.itemsize

    # Effective T-length mask replaces the [:, 1:-1] / [:, 2:] slices:
    # reps token j (1..T-2) pairs with attention_mask[:, j+1]; tokens 0, T-1 dropped.
    am = attention_mask.astype(jnp.float32)
    zcol = jnp.zeros((B, 1), jnp.float32)
    eff_mask = jnp.concatenate([zcol, am[:, 2:], zcol], axis=1)          # [B, T]

    TB, B_pad, vmem_cap, small_vmem = _plan_tiles(B, T, H, reps_itemsize, batch_tile)
    reps = last_hidden_state
    if B_pad != B:                         # pad awkward batches instead of full-batch fallback
        pad = B_pad - B
        reps = jnp.pad(reps, ((0, pad), (0, 0), (0, 0)))
        eff_mask = jnp.pad(eff_mask, ((0, pad), (0, 0)))

    grid = (B_pad // TB,)
    vmem_limit = _vmem_limit(TB, T, H, H2, Lp, reps_itemsize, w_itemsize,
                             vmem_cap, small_vmem)

    w_bytes = H * H2 * w_itemsize + H2 * 4 + H2 * Lp * w_itemsize + Lp * 4
    cost = pl.CostEstimate(
        flops=2 * B_pad * T * H + 2 * B_pad * H * H2 + 2 * B_pad * H2 * Lp,
        transcendentals=B_pad,
        bytes_accessed=(B_pad * T * H * reps_itemsize + B_pad * T * 4
                        + B_pad * Lp * 4 + w_bytes),
    )

    # NOTE: on v6e, if a profile ever shows exposed DMA between grid steps, sweep
    # pipeline_mode=pl.Buffered(3) on the reps BlockSpec (keep 2 buffers on v7x).
    out = pl.pallas_call(
        _classifier_kernel,
        out_shape=jax.ShapeDtypeStruct((B_pad, Lp), jnp.float32),
        grid=grid,
        in_specs=[
            pl.BlockSpec((TB, T, H), lambda b: (b, 0, 0)),     # reps: streamed per tile
            pl.BlockSpec((TB, T), lambda b: (b, 0)),           # effective mask (f32)
            # Constant-index weights: single-buffered, VMEM-resident for all steps.
            pl.BlockSpec((H, H2), lambda b: (0, 0), pipeline_mode=pl.Buffered(1)),
            pl.BlockSpec((1, H2), lambda b: (0, 0), pipeline_mode=pl.Buffered(1)),
            pl.BlockSpec((H2, Lp), lambda b: (0, 0), pipeline_mode=pl.Buffered(1)),
            pl.BlockSpec((1, Lp), lambda b: (0, 0), pipeline_mode=pl.Buffered(1)),
        ],
        out_specs=pl.BlockSpec((TB, Lp), lambda b: (b, 0)),
        compiler_params=pltpu.CompilerParams(
            dimension_semantics=("parallel",),
            vmem_limit_bytes=vmem_limit,
        ),
        cost_estimate=cost,
    )(reps, eff_mask, w1, b1, w2p, b2p)

    # classifier_out = self.__classifier_head(representation).view(-1)
    return out[:B, :label_size].reshape(-1)


def classifier_forward(last_hidden_state, attention_mask, prepared, *, batch_tile=None):
    """last_hidden_state: [B, T, H] f32/bf16, attention_mask: [B, T] f32/int."""
    return _forward_impl(last_hidden_state, attention_mask,
                         prepared["w1"], prepared["b1"],
                         prepared["w2p"], prepared["b2p"],
                         label_size=prepared["label_size"],
                         batch_tile=batch_tile)


# --------------------------------------------------------------------------- #
# Pure-JAX reference (mirrors the PyTorch module, f32 weights)
# --------------------------------------------------------------------------- #
def _reference_forward(last_hidden_state, attention_mask, raw_params):
    reps = last_hidden_state[:, 1:-1, :].astype(jnp.float32)
    mask = attention_mask[:, 2:].astype(jnp.float32)
    masked = reps * mask[:, :, None]
    pooled = masked.sum(axis=1) / mask.sum(axis=1, keepdims=True)
    h = jnp.maximum(pooled @ raw_params["w1"] + raw_params["b1"].reshape(1, -1), 0.0)
    return (h @ raw_params["w2"] + raw_params["b2"].reshape(1, -1)).reshape(-1)


# --------------------------------------------------------------------------- #
# Demo / self-test
# --------------------------------------------------------------------------- #
if __name__ == "__main__":
    # small shapes implied by the forward: batch=16, seq=8 tokens, hidden=32, labels=4
    B, T, H, LABELS = 16, 8, 32, 4

    key = jax.random.PRNGKey(0)
    k_x, k_w1, k_b1, k_w2, k_b2 = jax.random.split(key, 5)

    # synthetic BERT last_hidden_state + per-row valid lengths in [3, 7]
    last_hidden_state = jax.random.normal(k_x, (B, T, H), dtype=jnp.float32)
    row_len = 3 + (jnp.arange(B) % 5)
    attention_mask = (jnp.arange(T)[None, :] < row_len[:, None]).astype(jnp.float32)

    # classifier-head params; weights stored [in, out] (transpose of nn.Linear)
    raw_params = {
        "w1": jax.random.normal(k_w1, (H, 2 * H), dtype=jnp.float32) * 0.05,
        "b1": jax.random.normal(k_b1, (2 * H,), dtype=jnp.float32) * 0.05,
        "w2": jax.random.normal(k_w2, (2 * H, LABELS), dtype=jnp.float32) * 0.05,
        "b2": jax.random.normal(k_b2, (LABELS,), dtype=jnp.float32) * 0.05,
    }

    # 1) f32 weights + f32 reps, explicit batch tile -> 2-step grid (exercises pipeline)
    p32 = prepare_classifier_params(raw_params, weight_dtype=jnp.float32)
    out = jax.block_until_ready(
        classifier_forward(last_hidden_state, attention_mask, p32, batch_tile=8))
    ref = _reference_forward(last_hidden_state, attention_mask, raw_params)
    assert out.shape == (B * LABELS,)
    assert jnp.allclose(out, ref, atol=1e-4, rtol=1e-4), float(jnp.max(jnp.abs(out - ref)))

    # 2) awkward batch (B=13): exercises the padded-last-tile path (no full-batch fallback)
    Bo = 13
    out_odd = jax.block_until_ready(
        classifier_forward(last_hidden_state[:Bo], attention_mask[:Bo], p32, batch_tile=8))
    ref_odd = _reference_forward(last_hidden_state[:Bo], attention_mask[:Bo], raw_params)
    assert out_odd.shape == (Bo * LABELS,)
    assert jnp.allclose(out_odd, ref_odd, atol=1e-4, rtol=1e-4)

    # 3) bf16 hidden states + bf16 weights (default prep), auto tile selection
    p_bf = prepare_classifier_params(raw_params)              # bf16 weights
    lhs_bf16 = last_hidden_state.astype(jnp.bfloat16)
    out_bf = jax.block_until_ready(
        classifier_forward(lhs_bf16, attention_mask, p_bf))
    ref_bf = _reference_forward(lhs_bf16.astype(jnp.float32), attention_mask, raw_params)
    assert jnp.allclose(out_bf, ref_bf, atol=2e-2, rtol=2e-2), \
        float(jnp.max(jnp.abs(out_bf - ref_bf)))

    print("KERNEL_OK")
</pallas_src>

<mosaic_0001>
module attributes {stable_mosaic.version = 11 : i64} {
  func.func @_classifier_kernel(%arg0: i32, %arg1: memref<8x8x32xf32, #tpu.memory_space<vmem>>, %arg2: memref<8x8xf32, #tpu.memory_space<vmem>>, %arg3: memref<32x64xf32, #tpu.memory_space<vmem>>, %arg4: memref<1x64xf32, #tpu.memory_space<vmem>>, %arg5: memref<64x128xf32, #tpu.memory_space<vmem>>, %arg6: memref<1x128xf32, #tpu.memory_space<vmem>>, %arg7: memref<8x128xf32, #tpu.memory_space<vmem>>) attributes {dimension_semantics = [#tpu.dimension_semantics<parallel>], iteration_bounds = array<i64: 2>, scalar_prefetch = 0 : i64, scratch_operands = 0 : i64, tpu.core_type = #tpu.core_type<tc>, window_params = [{transform_indices = @transform_0, window_bounds = array<i64: 8, 8, 32>}, {transform_indices = @transform_1, window_bounds = array<i64: 8, 8>}, {pipeline_mode = #tpu.pipeline_mode<synchronous>, transform_indices = @transform_2, window_bounds = array<i64: 32, 64>}, {pipeline_mode = #tpu.pipeline_mode<synchronous>, transform_indices = @transform_3, window_bounds = array<i64: 1, 64>}, {pipeline_mode = #tpu.pipeline_mode<synchronous>, transform_indices = @transform_4, window_bounds = array<i64: 64, 128>}, {pipeline_mode = #tpu.pipeline_mode<synchronous>, transform_indices = @transform_5, window_bounds = array<i64: 1, 128>}, {transform_indices = @transform_6, window_bounds = array<i64: 8, 128>}]} {
    %c0 = arith.constant 0 : index
    %c0_0 = arith.constant 0 : index
    %c0_1 = arith.constant 0 : index
    %0 = vector.load %arg1[%c0, %c0_0, %c0_1] : memref<8x8x32xf32, #tpu.memory_space<vmem>>, vector<8x8x32xf32>
    %c0_2 = arith.constant 0 : index
    %c0_3 = arith.constant 0 : index
    %1 = vector.load %arg2[%c0_2, %c0_3] : memref<8x8xf32, #tpu.memory_space<vmem>>, vector<8x8xf32>
    %2 = vector.shape_cast %1 : vector<8x8xf32> to vector<8x8x1xf32>
    %3 = vector.broadcast %2 : vector<8x8x1xf32> to vector<8x8x32xf32>
    %4 = arith.mulf %0, %3 : vector<8x8x32xf32>
    %cst = arith.constant dense<0.000000e+00> : vector<8x32xf32>
    %5 = vector.multi_reduction <add>, %4, %cst [1] : vector<8x8x32xf32> to vector<8x32xf32>
    %cst_4 = arith.constant dense<0.000000e+00> : vector<8xf32>
    %6 = vector.multi_reduction <add>, %1, %cst_4 [1] : vector<8x8xf32> to vector<8xf32>
    %7 = vector.shape_cast %6 : vector<8xf32> to vector<8x1xf32>
    %cst_5 = arith.constant 1.000000e+00 : f32
    %8 = vector.broadcast %cst_5 : f32 to vector<8x1xf32>
    %9 = arith.maximumf %7, %8 : vector<8x1xf32>
    %10 = tpu.reciprocal %9 {approx = true} : vector<8x1xf32> -> vector<8x1xf32>
    %11 = arith.mulf %9, %10 : vector<8x1xf32>
    %cst_6 = arith.constant 2.000000e+00 : f32
    %12 = vector.broadcast %cst_6 : f32 to vector<8x1xf32>
    %13 = arith.subf %12, %11 : vector<8x1xf32>
    %14 = arith.mulf %10, %13 : vector<8x1xf32>
    %15 = vector.broadcast %14 : vector<8x1xf32> to vector<8x32xf32>
    %16 = arith.mulf %5, %15 : vector<8x32xf32>
    %c0_7 = arith.constant 0 : index
    %c0_8 = arith.constant 0 : index
    %17 = vector.load %arg3[%c0_7, %c0_8] : memref<32x64xf32, #tpu.memory_space<vmem>>, vector<32x64xf32>
    %cst_9 = arith.constant dense<0.000000e+00> : vector<8x64xf32>
    %18 = tpu.matmul %16, %17, %cst_9 {dimension_numbers = #tpu.dot_dimension_numbers<[1], [0], [0], [1], [0, 0, 1, 1], [], []>} : vector<8x32xf32>, vector<32x64xf32>, vector<8x64xf32> -> vector<8x64xf32>
    %c0_10 = arith.constant 0 : index
    %c0_11 = arith.constant 0 : index
    %19 = vector.load %arg4[%c0_10, %c0_11] : memref<1x64xf32, #tpu.memory_space<vmem>>, vector<1x64xf32>
    %20 = vector.broadcast %19 : vector<1x64xf32> to vector<8x64xf32>
    %21 = arith.addf %18, %20 : vector<8x64xf32>
    %cst_12 = arith.constant 0.000000e+00 : f32
    %22 = vector.broadcast %cst_12 : f32 to vector<8x64xf32>
    %23 = arith.maximumf %21, %22 : vector<8x64xf32>
    %c0_13 = arith.constant 0 : index
    %c0_14 = arith.constant 0 : index
    %24 = vector.load %arg5[%c0_13, %c0_14] : memref<64x128xf32, #tpu.memory_space<vmem>>, vector<64x128xf32>
    %cst_15 = arith.constant dense<0.000000e+00> : vector<8x128xf32>
    %25 = tpu.matmul %23, %24, %cst_15 {dimension_numbers = #tpu.dot_dimension_numbers<[1], [0], [0], [1], [0, 0, 1, 1], [], []>} : vector<8x64xf32>, vector<64x128xf32>, vector<8x128xf32> -> vector<8x128xf32>
    %c0_16 = arith.constant 0 : index
    %c0_17 = arith.constant 0 : index
    %26 = vector.load %arg6[%c0_16, %c0_17] : memref<1x128xf32, #tpu.memory_space<vmem>>, vector<1x128xf32>
    %27 = vector.broadcast %26 : vector<1x128xf32> to vector<8x128xf32>
    %28 = arith.addf %25, %27 : vector<8x128xf32>
    %c0_18 = arith.constant 0 : index
    %c0_19 = arith.constant 0 : index
    %29 = vector.load %arg7[%c0_18, %c0_19] : memref<8x128xf32, #tpu.memory_space<vmem>>, vector<8x128xf32>
    tpu.vector_store %arg7[%c0_18, %c0_19], %28 {strides = array<i32>} : memref<8x128xf32, #tpu.memory_space<vmem>>, vector<8x128xf32>,
    return
  }
  func.func @transform_0(%arg0: i32) -> (i32, i32, i32) {
    %c0_i32 = arith.constant 0 : i32
    %c0_i32_0 = arith.constant 0 : i32
    %c0_i32_1 = arith.constant 0 : i32
    return %arg0, %c0_i32, %c0_i32_0 : i32, i32, i32
  }
  func.func @transform_1(%arg0: i32) -> (i32, i32) {
    %c0_i32 = arith.constant 0 : i32
    %c0_i32_0 = arith.constant 0 : i32
    return %arg0, %c0_i32 : i32, i32
  }
  func.func @transform_2(%arg0: i32) -> (i32, i32) {
    %c0_i32 = arith.constant 0 : i32
    %c0_i32_0 = arith.constant 0 : i32
    %c0_i32_1 = arith.constant 0 : i32
    return %c0_i32, %c0_i32_0 : i32, i32
  }
  func.func @transform_3(%arg0: i32) -> (i32, i32) {
    %c0_i32 = arith.constant 0 : i32
    %c0_i32_0 = arith.constant 0 : i32
    %c0_i32_1 = arith.constant 0 : i32
    return %c0_i32, %c0_i32_0 : i32, i32
  }
  func.func @transform_4(%arg0: i32) -> (i32, i32) {
    %c0_i32 = arith.constant 0 : i32
    %c0_i32_0 = arith.constant 0 : i32
    %c0_i32_1 = arith.constant 0 : i32
    return %c0_i32, %c0_i32_0 : i32, i32
  }
  func.func @transform_5(%arg0: i32) -> (i32, i32) {
    %c0_i32 = arith.constant 0 : i32
    %c0_i32_0 = arith.constant 0 : i32
    %c0_i32_1 = arith.constant 0 : i32
    return %c0_i32, %c0_i32_0 : i32, i32
  }
  func.func @transform_6(%arg0: i32) -> (i32, i32) {
    %c0_i32 = arith.constant 0 : i32
    %c0_i32_0 = arith.constant 0 : i32
    return %arg0, %c0_i32 : i32, i32
  }
}

</mosaic_0001>

<bundles_post_ra>
// kernel: _forward_impl.1
= control target key start
LH: loop header
LB: loop body
LE: loop exit
PB: predicated region body
PF: predicated region fallthrough
CT: control target
= control target key end

     0   :  { %11 = vsyncpa [#allocation3], 0  ;;  %s1143_s0 = inlined_call_operand.hbm [shape: f32[16,8,32], index: 0, kind: input, shape index: {}]   ;;  %s1144_s1 = inlined_call_operand.vmem [shape: f32[16,8], index: 1, kind: input, shape index: {}]   ;;  %s1145_s2 = inlined_call_operand.vmem [shape: f32[32,64], index: 2, kind: input, shape index: {}]   ;;  %s1146_s3 = inlined_call_operand.vmem [shape: f32[1,64], index: 3, kind: input, shape index: {}]   ;;  %s1147_s4 = inlined_call_operand.vmem [shape: f32[64,128], index: 4, kind: input, shape index: {}]   ;;  %s1148_s5 = inlined_call_operand.vmem [shape: f32[1,128], index: 5, kind: input, shape index: {}]   ;;  %s1149_s6 = inlined_call_operand.vmem [shape: f32[16,128], index: 6, kind: output, shape index: {}]  }
   0x1   :  { %13 = vsyncpa [#allocation3 + $0x1], 0  ;;  %s963_s21 = smov 0   ;;  %s965_s22 = smov 0  }
   0x2   :  { %s967_s23 = smov 0   ;;  %s969_s24 = smov 0  }
   0x3 LB: > { %s982_s25 = sadd.s32 4294967295, %s920_s24   ;;  %s985_s26 = sadd.s32 1, %s920_s24   ;;  %s920_s24 = sphi %s969_s24, %s1156_s24   ;;  %s916_s23 = sphi %s967_s23, %s1155_s23   ;;  %s912_s22 = sphi %s965_s22, %s1154_s22   ;;  %s908_s21 = sphi %s963_s21, %s1153_s21  }
   0x4   : > { %s23_s27 = ssub.s32 %s920_s24, %s985_s26  ;;  %s26_s28 = sadd.s32 1, %s916_s23 }
   0x5   : > { %p24_p0 = scmp.eq.s32.totalorder %s23_s27, 0  ;;  %p33_p1 = scmp.ne.s32.totalorder %s916_s23, %s912_s22 }
   0x6   : > { %p34_p2 = scmp.eq.s32.totalorder %s920_s24, 0  ;;  %p39_p3 = scmp.ne.s32.totalorder %s912_s22, %s908_s21 }
   0x7   : > { %s995_s29 = scalar_select %p24_p0, %s916_s23, %s26_s28  }
   0x8   : > { %p35_p4 = por %p34_p2, %p33_p1  ;;  %p40_p5 = scmp.eq.s32.totalorder %s982_s25, 0 }
   0x9   : > { %p816_p6 = scmp.lt.s32.totalorder %s920_s24, 2  ;;  %s211_s7 = sand.u32 1, %s916_s23  }
   0xa   : > { %p999_p7 = por %p40_p5, %p39_p3  ;;  %s734_s8 = sshll.u32 %s211_s7, 6 }
   0xb   : > { %s747_s9 = sshll.u32 %s920_s24, 10  ;;  %s215_s13 = scalar_lea.vmem [#allocation2], %s734_s8 }
   0xc   : > { %s1008_s12 = scalar_lea.hbm %s1143_s0, %s747_s9  ;;  %s222_s14 = sshll.u32 %s215_s13, 4  ;;  %s1010_s14 = int_to_ptr.vmem [resolvable:$true] %s222_s14 }
   0xd   : > { %p1012_p8 = pnand %p816_p6, %p35_p4  ;;  %s1017_s16 = scalar_lea.sflag [#allocation3], %s211_s7 }
   0xe   : > { %s856_s17 = scalar_lea.hbm %s1008_s12, 1024  ;;  %s861_s20 = scalar_lea.hbm %s1143_s0, 2048 }
   0xf   : > { %p857_p10 = scmp.ne.s32.totalorder %s1008_s12, %s856_s17  ;;  %p858_p11 = pneg %p1012_p8 }
  0x10   : > { %p862_p0 = scmp.lt.u32.totalorder %s1008_s12, %s1143_s0  ;;  %p863_p1 = scmp.lt.u32.totalorder %s861_s20, %s856_s17 }
  0x11   : > { %p859_p12 = pnand %p858_p11, %p857_p10  ;;  %p865_p3 = scmp.lt.u32.totalorder %s856_s17, %s1008_s12 }
  0x12   : > { %p864_p2 = por %p863_p1, %p862_p0 }
  0x13   : > { %p860_p13 = pneg %p859_p12 }
  0x14   : > { %p866_p4 = por %p865_p3, %p864_p2 }
  0x16   : > { %p867_p5 = pnand %p866_p4, %p860_p13 }
  0x18   : > { %870 = shalt.err (!%p867_p5)
}
  0x19   : > { %s871_s28 = scalar_lea.vmem %s1010_s14, 1024  ;;  %s922_s7 = smov [#allocation2]  }
  0x1a   : > { %p872_p6 = scmp.ne.s32.totalorder %s1010_s14, %s871_s28  ;;  %s876_s8 = sshll.u32 %s922_s7, 4  ;;  %s877_s8 = int_to_ptr.vmem [resolvable:$false] %s876_s8 }
  0x1b   : > { %s878_s9 = scalar_lea.vmem %s877_s8, 2048  ;;  %p879_p9 = scmp.lt.s32.totalorder %s1010_s14, %s877_s8 }
  0x1c   : > { %p874_p10 = pnand %p872_p6, %p858_p11  ;;  %p880_p0 = scmp.lt.s32.totalorder %s878_s9, %s871_s28 }
  0x1e   : > { %p875_p12 = pneg %p874_p10  ;;  %p881_p1 = por %p880_p0, %p879_p9 }
  0x20   : > { %p882_p2 = pnand %p881_p1, %p875_p12 }
  0x22   : > { %885 = shalt.err (!%p882_p2)
}
  0x23   : > { %s923_s10 = smov 128   ;;  %s924_s11 = smov 8  }
  0x24   : > { %815 = dma.hbm_to_vmem [thread:$0]  (!%p1012_p8), %s1008_s12, 1024, %s1010_s14, %s1017_s16, %s923_s10, %s923_s10, %s924_s11  }
  0x25   : > { %p237_p11 = scmp.lt.s32.totalorder %s920_s24, 3  ;;  %p1152_p13 = scmp.ge.s32.totalorder %s920_s24, 1 }
  0x27   : > { %p238_p3 = pnand %p1152_p13, %p237_p11 }
  0x28   : > { %s243_s13 = sand.u32 (!%p238_p3), 1, %s912_s22  }
  0x29   : > { %241 = sbr.rel (%p238_p3) target bundleno = 661 (0x295), region = 44  ;;  %s738_s17 = sshll.u32 (!%p238_p3), %s243_s13, 6 }
  0x2a   : > { %s244_s18 = scalar_lea.sflag (!%p238_p3), [#allocation3], %s243_s13  ;;  %s1049_s19 = scalar_lea.vmem (!%p238_p3), [#allocation2], %s738_s17 }
  0x30   : > { %903 = dma.done.wait (%p999_p7), %s244_s18, 1024  }
  0x31   : > { %905 = vsyncadd (%p999_p7), %s244_s18, 4294966272  ;;  %p280_p9 = scmp.lt.s32.totalorder %s982_s25, 1  ;;  %v297_v0 = vlaneseq  ;;  %vm418_vm0 = vcmask 64512   ;;  %v451_v20 = vld [vmem:[%s1145_s2] sm:$0xff]  ;;  %v452_v21 = vld [vmem:[%s1145_s2 + $0x8] sm:$0xff]  ;;  %v925_v23 = vmov 0.0|0.0  }
  0x32   : > { %v793_v22 = vpack.c.bf16 %v452_v21, %v451_v20  ;;  %792 = vmatprep.subr.bf16.mxu0 %v925_v23  ;;  %798 = vmatprep.subr.bf16.mxu1 %v925_v23  ;;  %v453_v24 = vld [vmem:[%s1145_s2 + $0x10] sm:$0xff]  ;;  %v454_v25 = vld [vmem:[%s1145_s2 + $0x18] sm:$0xff]  ;;  %vm926_vm1 = vmmov 0   ;;  %v927_v27 = vmov 0.0   ;;  %v564_v28 = vld [vmem:[%s1147_s4] sm:$0xff]  ;;  %vm361_vm2 = vcmask 261120  }
  0x33   : > { %s1158_s25 = smov (!%p280_p9, %s982_s25), 1  ;;  %v298_v1 = vshrl.u32 %v297_v0, 7  ;;  %v796_v26 = vpack.c.bf16 %v454_v25, %v453_v24  ;;  %770 = vmatprep.mubr.msk.f32.mxu0 %vm926_vm1, %v927_v27  ;;  %789 = vmatprep.mubr.msk.f32.mxu1 %vm926_vm1, %v927_v27  ;;  %v565_v29 = vld [vmem:[%s1147_s4 + $0x8] sm:$0xff]  ;;  %v566_v30 = vld [vmem:[%s1147_s4 + $0x10] sm:$0xff]  ;;  %v567_v32 = vld [vmem:[%s1147_s4 + $0x18] sm:$0xff]  ;;  %vm471_vm3 = vcmask 1041409  }
  0x34   : > { %s739_s24 = sshll.u32 %s1158_s25, 3  ;;  %794 = vmatpush3.bf16.msra.mxu0 %v793_v22  ;;  %v799_v31 = vpack.c.bf16 %v565_v29, %v564_v28  ;;  %v802_v33 = vpack.c.bf16 %v567_v32, %v566_v30  ;;  %v568_v34 = vld [vmem:[%s1147_s4 + $0x20] sm:$0xff]  ;;  %v569_v35 = vld [vmem:[%s1147_s4 + $0x28] sm:$0xff]  ;;  %v290_v41 = vld [vmem:[%s1049_s19 + $0x10] sm:$0xff]  ;;  %vm474_vm4 = vcmask 1042434   ;;  %vm477_vm5 = vcmask 1043459  }
  0x35   : > { %v313_v2 = vsub.s32 2, %v298_v1  ;;  %s283_s15 = scalar_lea.vmem %s1144_s1, %s739_s24  ;;  %v299_v3 = vsub.s32 0, %v298_v1  ;;  %v320_v8 = vsub.s32 3, %v298_v1  ;;  %v327_v10 = vsub.s32 4, %v298_v1  ;;  %795 = vmatprep.subr.bf16.mxu0 %v925_v23  ;;  %v288_v42 = vld [vmem:[%s1049_s19] sm:$0xff]  ;;  %v291_v43 = vld [vmem:[%s1049_s19 + $0x18] sm:$0xff]  ;;  %s287_s17 = scalar_lea.vmem %s1149_s6, %s739_s24 }
  0x36   : > { %v296_v4 = vld [vmem:[%s283_s15] sm:$0xff]  ;;  %v334_v12 = vsub.s32 5, %v298_v1  ;;  %v341_v14 = vsub.s32 6, %v298_v1  ;;  %v306_v15 = vsub.s32 1, %v298_v1  ;;  %v348_v17 = vsub.s32 7, %v298_v1  ;;  %800 = vmatpush3.bf16.msra.mxu1 %v799_v31  ;;  %v293_v46 = vld [vmem:[%s1049_s19 + $0x28] sm:$0xff] }
  0x37   : > { %v419_v5 = vsel %vm418_vm0, %v296_v4, 0.0  ;;  %v314_v6 = vrot.slane %v296_v4, %v313_v2  ;;  %v300_v7 = vrot.slane %v296_v4, %v299_v3  ;;  %v321_v9 = vrot.slane %v296_v4, %v320_v8  ;;  %801 = vmatprep.subr.bf16.mxu1 %v925_v23  ;;  %v292_v44 = vld [vmem:[%s1049_s19 + $0x20] sm:$0xff]  ;;  %v294_v52 = vld [vmem:[%s1049_s19 + $0x30] sm:$0xff]  ;;  %v295_v59 = vld [vmem:[%s1049_s19 + $0x38] sm:$0xff] }
  0x38   : > { %420 = vadd.xlane.f32.xlu0 %v419_v5  ;;  %v328_v11 = vrot.slane %v296_v4, %v327_v10  ;;  %v335_v13 = vrot.slane %v296_v4, %v334_v12  ;;  %v342_v16 = vrot.slane %v296_v4, %v341_v14  ;;  %v307_v18 = vrot.slane %v296_v4, %v306_v15  ;;  %v289_v10 = vld [vmem:[%s1049_s19 + $0x8] sm:$0xff] }
  0x39   : > { %316 = vbcast.lane.b32.xlu1 %v314_v6, 256  ;;  %v349_v19 = vrot.slane %v296_v4, %v348_v17  ;;  %797 = vmatpush3.bf16.msra.mxu0 %v796_v26  ;;  %v805_v36 = vpack.c.bf16 %v569_v35, %v568_v34  ;;  %vm480_vm6 = vcmask 1044484   ;;  %vm483_vm7 = vcmask 1045509  }
  0x3a   : > { %803 = vmatpush3.bf16.msra.mxu1 %v802_v33  ;;  %vm486_vm8 = vcmask 1046534   ;;  %vm489_vm9 = vcmask 1047559   ;;  %vm579_vm10 = vcmask 523264  }
  0x3b   : > { %804 = vmatprep.subr.bf16.mxu1 %v925_v23 }
  0x3d   : > { %302 = vbcast.lane.b32.xlu1 %v300_v7, 256 }
  0x3e   : > { %806 = vmatpush3.bf16.msra.mxu1 %v805_v36 }
  0x3f   : > { %807 = vmatprep.subr.bf16.mxu1 %v925_v23 }
  0x41   : > { %323 = vbcast.lane.b32.xlu1 %v321_v9, 256 }
  0x45   : > { %330 = vbcast.lane.b32.xlu1 %v328_v11, 256 }
  0x49   : > { %337 = vbcast.lane.b32.xlu1 %v335_v13, 256 }
  0x4d   : > { %344 = vbcast.lane.b32.xlu1 %v342_v16, 256 }
  0x4e   : > { %309 = vbcast.lane.b32.xlu0 %v307_v18, 256 }
  0x51   : > { %351 = vbcast.lane.b32.xlu1 %v349_v19, 256 }
  0xab   : > { %v317_v37 = vpop.permute.xlu1 %316 }
  0xac   : > { %v355_v47 = vmul.f32 %v317_v37, %v290_v41 }
  0xae   : > { %v376_v54 = vsel %vm361_vm2, %v355_v47, 0.0 }
  0xaf   : > { %v303_v38 = vpop.permute.xlu1 %302  ;;  %v377_v61 = vrot.slane %v376_v54, 4 }
  0xb0   : > { %v353_v48 = vmul.f32 %v303_v38, %v288_v42 }
  0xb1   : > { %v378_v8 = vadd.f32 %v377_v61, %v376_v54 }
  0xb2   : > { %v362_v55 = vsel %vm361_vm2, %v353_v48, 0.0 }
  0xb3   : > { %v324_v39 = vpop.permute.xlu1 %323  ;;  %v363_v62 = vrot.slane %v362_v55, 4  ;;  %v379_v18 = vrot.slane %v378_v8, 2 }
  0xb4   : > { %v356_v49 = vmul.f32 %v324_v39, %v291_v43 }
  0xb5   : > { %v364_v9 = vadd.f32 %v363_v62, %v362_v55  ;;  %v380_v27 = vadd.f32 %v379_v18, %v378_v8 }
  0xb6   : > { %v383_v56 = vsel %vm361_vm2, %v356_v49, 0.0 }
  0xb7   : > { %v331_v40 = vpop.permute.xlu1 %330  ;;  %v384_v0 = vrot.slane %v383_v56, 4  ;;  %v365_v19 = vrot.slane %v364_v9, 2  ;;  %v381_v37 = vrot.slane %v380_v27, 1 }
  0xb8   : > { %v357_v50 = vmul.f32 %v331_v40, %v292_v44 }
  0xb9   : > { %v385_v12 = vadd.f32 %v384_v0, %v383_v56  ;;  %v366_v30 = vadd.f32 %v365_v19, %v364_v9  ;;  %v382_v48 = vadd.f32 %v381_v37, %v380_v27  ;;  %v741_v27 = vld [vmem:[%s1146_s3] ss:$0 sm:$0xff] }
  0xba   : > { %v390_v57 = vsel %vm361_vm2, %v357_v50, 0.0 }
  0xbb   : > { %v338_v45 = vpop.permute.xlu1 %337  ;;  %v391_v1 = vrot.slane %v390_v57, 4  ;;  %v386_v21 = vrot.slane %v385_v12, 2  ;;  %v367_v41 = vrot.slane %v366_v30, 1 }
  0xbc   : > { %v358_v51 = vmul.f32 %v338_v45, %v293_v46 }
  0xbd   : > { %v392_v13 = vadd.f32 %v391_v1, %v390_v57  ;;  %v387_v31 = vadd.f32 %v386_v21, %v385_v12 }
  0xbe   : > { %v397_v60 = vsel %vm361_vm2, %v358_v51, 0.0  ;;  %v368_v51 = vadd.f32 %v367_v41, %v366_v30 }
  0xbf   : > { %v345_v53 = vpop.permute.xlu1 %344  ;;  %v398_v3 = vrot.slane %v397_v60, 4  ;;  %v393_v22 = vrot.slane %v392_v13, 2  ;;  %v388_v42 = vrot.slane %v387_v31, 1 }
  0xc0   : > { %v359_v58 = vmul.f32 %v345_v53, %v294_v52 }
  0xc1   : > { %v399_v15 = vadd.f32 %v398_v3, %v397_v60  ;;  %v394_v32 = vadd.f32 %v393_v22, %v392_v13  ;;  %v389_v52 = vadd.f32 %v388_v42, %v387_v31 }
  0xc2   : > { %v404_v5 = vsel %vm361_vm2, %v359_v58, 0.0 }
  0xc3   : > { %v352_v63 = vpop.permute.xlu1 %351  ;;  %v405_v14 = vrot.slane %v404_v5, 4  ;;  %v400_v25 = vrot.slane %v399_v15, 2  ;;  %v395_v43 = vrot.slane %v394_v32, 1 }
  0xc4   : > { %v360_v2 = vmul.f32 %v352_v63, %v295_v59 }
  0xc5   : > { %v421_v4 = vpop.xlane.xlu0 %420  ;;  %v406_v23 = vadd.f32 %v405_v14, %v404_v5  ;;  %v401_v34 = vadd.f32 %v400_v25, %v399_v15  ;;  %v396_v53 = vadd.f32 %v395_v43, %v394_v32  ;;  %v571_v25 = vld [vmem:[%s1147_s4 + $0x38] sm:$0xff]  ;;  %v743_v32 = vld [vmem:[%s1148_s5] ss:$0 sm:$0xff] }
  0xc6   : > { %v422_v6 = vmax.f32 %v421_v4, 1.0  ;;  %v411_v7 = vsel %vm361_vm2, %v360_v2, 0.0 }
  0xc7   : > { %v412_v11 = vrot.slane %v411_v7, 4  ;;  %v407_v33 = vrot.slane %v406_v23, 2  ;;  %v402_v45 = vrot.slane %v401_v34, 1 }
  0xc8   : > { %854 = vrcp.f32 %v422_v6 }
  0xc9   : > { %v310_v16 = vpop.permute.xlu0 %309  ;;  %v413_v20 = vadd.f32 %v412_v11, %v411_v7  ;;  %v408_v44 = vadd.f32 %v407_v33, %v406_v23  ;;  %v403_v55 = vadd.f32 %v402_v45, %v401_v34 }
  0xca   : > { %v354_v17 = vmul.f32 %v310_v16, %v289_v10 }
  0xcb   : > { %v414_v29 = vrot.slane %v413_v20, 2  ;;  %v409_v54 = vrot.slane %v408_v44, 1 }
  0xcc   : > { %v369_v24 = vsel %vm361_vm2, %v354_v17, 0.0 }
  0xcd   : > { %v370_v26 = vrot.slane %v369_v24, 4  ;;  %v415_v40 = vadd.f32 %v414_v29, %v413_v20  ;;  %v410_v3 = vadd.f32 %v409_v54, %v408_v44 }
  0xcf   : > { %v371_v28 = vadd.f32 %v370_v26, %v369_v24  ;;  %v416_v50 = vrot.slane %v415_v40, 1  ;;  %v570_v24 = vld [vmem:[%s1147_s4 + $0x30] sm:$0xff] }
  0xd0   : > { %v808_v26 = vpack.c.bf16 %v571_v25, %v570_v24 }
  0xd1   : > { %v372_v35 = vrot.slane %v371_v28, 2  ;;  %v417_v0 = vadd.f32 %v416_v50, %v415_v40 }
  0xd2   : > { %v855_v36 = vpop.eup %854  ;;  %809 = vmatpush3.bf16.msra.mxu1 %v808_v26 }
  0xd3   : > { %v424_v38 = vmul.f32 %v855_v36, %v422_v6  ;;  %v373_v39 = vadd.f32 %v372_v35, %v371_v28 }
  0xd5   : > { %v425_v46 = vsub.f32 2.0, %v424_v38  ;;  %v374_v47 = vrot.slane %v373_v39, 1 }
  0xd7   : > { %v426_v49 = vmul.f32 %v855_v36, %v425_v46  ;;  %v375_v57 = vadd.f32 %v374_v47, %v373_v39 }
  0xd9   : > { %v428_v56 = vrot.slane %v426_v49, 1  ;;  %v429_v58 = vrot.slane %v426_v49, 2  ;;  %v433_v59 = vrot.slane %v426_v49, 6  ;;  %v430_v60 = vrot.slane %v426_v49, 3 }
  0xda   : > { %v431_v61 = vrot.slane %v426_v49, 4  ;;  %v432_v62 = vrot.slane %v426_v49, 5  ;;  %v434_v1 = vrot.slane %v426_v49, 7  ;;  %v443_v6 = vmul.f32 %v426_v49, %v368_v51 }
  0xdb   : > { %v444_v63 = vmul.f32 %v428_v56, %v375_v57  ;;  %v445_v2 = vmul.f32 %v429_v58, %v382_v48  ;;  %v446_v4 = vmul.f32 %v430_v60, %v389_v52  ;;  %v449_v10 = vmul.f32 %v433_v59, %v410_v3 }
  0xdc   : > { %v447_v5 = vmul.f32 %v431_v61, %v396_v53  ;;  %v448_v8 = vmul.f32 %v432_v62, %v403_v55  ;;  %v450_v12 = vmul.f32 %v434_v1, %v417_v0 }
  0xdd   : > { %v470_v7 = vrot.slane %v444_v63, 7  ;;  %v473_v9 = vrot.slane %v445_v2, 6  ;;  %v476_v13 = vrot.slane %v446_v4, 5  ;;  %v485_v18 = vrot.slane %v449_v10, 2 }
  0xde   : > { %v479_v15 = vrot.slane %v447_v5, 4  ;;  %v482_v17 = vrot.slane %v448_v8, 3  ;;  %v488_v21 = vrot.slane %v450_v12, 1 }
  0xdf   : > { %v472_v11 = vsel %vm471_vm3, %v470_v7, %v443_v6 }
  0xe0   : > { %v475_v14 = vsel %vm474_vm4, %v473_v9, %v472_v11 }
  0xe1   : > { %v478_v16 = vsel %vm477_vm5, %v476_v13, %v475_v14 }
  0xe2   : > { %v481_v19 = vsel %vm480_vm6, %v479_v15, %v478_v16 }
  0xe3   : > { %v484_v20 = vsel %vm483_vm7, %v482_v17, %v481_v19 }
  0xe4   : > { %v487_v22 = vsel %vm486_vm8, %v485_v18, %v484_v20 }
  0xe5   : > { %v490_v23 = vsel %vm489_vm9, %v488_v21, %v487_v22 }
  0xe6   : > { %771 = vmatmul.mubr.msk.f32.vlgmr.msra.gmra.mrb[0].mxu0 %vm361_vm2, %v490_v23 }
 0x1b9   : > { %v559_v28 = vpop.f32.mrb[0].mxu0 }
 0x1ba   : > { %v560_v29 = vadd.f32 %v741_v27, %v559_v28  ;;  %v772_v30 = vpop.f32.mrb[1].mxu0 }
 0x1bc   : > { %v563_v31 = vmax.f32 %v560_v29, 0.0 }
 0x1be   : > { %790 = vmatmul.mubr.msk.f32.vlgmr.msra.gmra.mrb[0].mxu1 %vm579_vm10, %v563_v31 }
 0x291   : > { %v649_v33 = vpop.f32.mrb[0].mxu1 }
 0x292   : > { %v650_v34 = vadd.f32 %v743_v32, %v649_v33  ;;  %v791_v35 = vpop.f32.mrb[1].mxu1 }
 0x294   : > { %653 = vst [vmem:[%s287_s17] sm:$0xff] %v650_v34 }
 0x295 PF: > { %p16_p7 = scmp.ge.s32.totalorder %s985_s26, 4   ;;  %s1153_s21 = smov %s912_s22 }
 0x296   : > { %s1154_s22 = smov %s916_s23  ;;  %s1155_s23 = smov %s995_s29 }
 0x297   : > { %s1156_s24 = smov %s985_s26  ;;  %18 = sbr.rel (!%p16_p7) target bundleno = 3 (0x3), region = 87 }
 0x29e   :  { %673 = vsyncpa [#allocation3], 1 }
 0x29f   :  { %675 = vsyncpa [#allocation3 + $0x1], 1 }

</bundles_post_ra>
